<compile_context>
chip_gen: v7x
topology: tpu7x:2x2x1
jax: 0.10.0
libtpu: 0.0.40
codegen_flags: <defaults>
</compile_context>

<pallas_src>
import jax
import jax.numpy as jnp
from jax.experimental import pallas as pl
from jax.experimental.pallas import tpu as pltpu

HID = 16      # hidden width of the MLP
LANES = 128   # TPU vreg lane width


def _sqrtnn_kernel(x_ref, w2_ref, vec_ref, o_ref):
    """Fused 3-layer MLP on one (1, TBL) lane-dense batch tile.

    Layout: batch on lanes, hidden (16) on sublanes.
    """
    x = x_ref[...]                      # (1, TBL)   f32, batch on lanes
    vp = vec_ref[...]                   # (HID, 5)   packed small params (columns)
    w1c = vp[:, 0:1]                    # (HID, 1)   layer-1 weight column
    b1c = vp[:, 1:2]                    # (HID, 1)
    b2c = vp[:, 2:3]                    # (HID, 1)
    w3c = vp[:, 3:4]                    # (HID, 1)   layer-3 weight column
    b3 = vp[0:1, 4:5]                   # (1, 1)

    # Layer 1: in_features == 1 -> VPU broadcast FMA, full lane density.
    h1 = jnp.maximum(w1c * x + b1c, 0.0)                       # (HID, TBL)
    # Layer 2: (16,16) @ (16,TBL) on the MXU (batch fills the output width).
    h2 = jnp.dot(w2_ref[...], h1, preferred_element_type=jnp.float32)
    h2 = jnp.maximum(h2 + b2c, 0.0)                            # (HID, TBL)
    # Layer 3: out_features == 1 -> VPU multiply + XLU sublane reduce.
    y = jnp.sum(h2 * w3c, axis=0, keepdims=True) + b3          # (1, TBL)
    o_ref[...] = y.astype(o_ref.dtype)


def prep_params(params):
    """One-time parameter prep (hoisted out of the per-call path).

    torch convention: w1 (16,1), b1 (16,), w2 (16,16), b2 (16,), w3 (1,16),
    b3 (1,).  Layer 2 is computed in column form h2 = W2 @ h1, so w2 keeps
    its torch (out, in) orientation; the small vectors are packed as columns
    of one (16, 5) array: [w1, b1, b2, w3, b3].
    """
    w1c = params["w1"].astype(jnp.float32).reshape(HID)
    b1 = params["b1"].astype(jnp.float32).reshape(HID)
    b2 = params["b2"].astype(jnp.float32).reshape(HID)
    w3c = params["w3"].astype(jnp.float32).reshape(HID)
    b3 = jnp.broadcast_to(params["b3"].astype(jnp.float32).reshape(()), (HID,))
    vec = jnp.stack([w1c, b1, b2, w3c, b3], axis=1)            # (HID, 5)
    w2 = params["w2"].astype(jnp.float32)                      # (out, in) = (16, 16)
    return {"w2": w2, "vec": vec}


def sqrtnn_forward(x, prepped, *, block_lanes=32768):
    """x: (B, 1) or (B,) float32.  prepped: output of prep_params()."""
    B = x.shape[0]
    xf = jnp.reshape(x.astype(jnp.float32), (-1,))             # flat (B,), free

    # Tile lane width: multiple of 128.
    if B <= block_lanes:
        tbl = ((B + LANES - 1) // LANES) * LANES               # single grid step
    else:
        tbl = max(LANES, (block_lanes // LANES) * LANES)
        # Keep >= 8 grid steps so a v7x (2 TCs) still gets several pipelined
        # steps per core (no-op on v5e/v6e: single TC).
        while tbl > 4096 and pl.cdiv(B, tbl) < 8:
            tbl //= 2
    nb = pl.cdiv(B, tbl)
    B_pad = nb * tbl
    if B_pad != B:
        xf = jnp.pad(xf, (0, B_pad - B))                       # ragged tail only
    x2 = xf.reshape(1, B_pad)                                   # batch on lanes

    # VMEM per step (f32): x/y tiles (8x sublane-padded, double-buffered)
    # ~2 MiB each at TBL=32768, (16,TBL) intermediates ~2 MiB each — total
    # ~10 MiB, inside every generation's budget (incl. v7x's 64 MiB VMEM).
    out = pl.pallas_call(
        _sqrtnn_kernel,
        out_shape=jax.ShapeDtypeStruct((1, B_pad), jnp.float32),
        grid=(nb,),
        in_specs=[
            pl.BlockSpec((1, tbl), lambda i: (0, i)),        # x: streamed, lane-dense
            pl.BlockSpec((HID, HID), lambda i: (0, 0)),      # w2: constant block (no re-fetch)
            pl.BlockSpec((HID, 5), lambda i: (0, 0)),        # packed small params
        ],
        out_specs=pl.BlockSpec((1, tbl), lambda i: (0, i)),  # y: lane-dense store
        compiler_params=pltpu.CompilerParams(
            dimension_semantics=("parallel",),               # batch axis over TCs (v7x)
            vmem_limit_bytes=32 * 1024 * 1024),
    )(x2, prepped["w2"], prepped["vec"])

    yf = out.reshape(B_pad)
    if B_pad != B:
        yf = yf[:B]
    return yf.reshape(B, 1)


def init_params(key):
    """Deterministic init mimicking nn.Linear default (uniform +/- 1/sqrt(fan_in))."""
    ks = jax.random.split(key, 6)

    def lin(kw, kb, fan_in, fan_out):
        bound = 1.0 / jnp.sqrt(fan_in)
        w = jax.random.uniform(kw, (fan_out, fan_in), jnp.float32, -bound, bound)
        b = jax.random.uniform(kb, (fan_out,), jnp.float32, -bound, bound)
        return w, b

    w1, b1 = lin(ks[0], ks[1], 1, 16)
    w2, b2 = lin(ks[2], ks[3], 16, 16)
    w3, b3 = lin(ks[4], ks[5], 16, 1)
    return {"w1": w1, "b1": b1, "w2": w2, "b2": b2, "w3": w3, "b3": b3}


def reference_forward(x, p):
    h1 = jnp.maximum(x @ p["w1"].T + p["b1"], 0.0)
    h2 = jnp.maximum(h1 @ p["w2"].T + p["b2"], 0.0)
    return h2 @ p["w3"].T + p["b3"]


if __name__ == "__main__":
    key = jax.random.PRNGKey(0)
    kx, kp = jax.random.split(key)
    params = init_params(kp)
    prepped = prep_params(params)          # hoisted, one-time param prep

    B = 1024
    x = jax.random.uniform(kx, (B, 1), jnp.float32, 0.0, 10.0)  # sqrt-like inputs

    fwd = jax.jit(lambda xv: sqrtnn_forward(xv, prepped))
    y = jax.block_until_ready(fwd(x))
    y_ref = reference_forward(x, params)
    assert y.shape == (B, 1)
    assert jnp.allclose(y, y_ref, atol=1e-3, rtol=1e-3), "mismatch vs reference"

    # Multi-step grid path (4 tiles of 256 lanes each).
    y_multi = jax.block_until_ready(
        jax.jit(lambda xv: sqrtnn_forward(xv, prepped, block_lanes=256))(x))
    assert jnp.allclose(y_multi, y_ref, atol=1e-3, rtol=1e-3), "multi-tile mismatch"

    # Ragged batch path (pads only the tail up to the next multiple of 128).
    x_rag = x[:777]
    y_rag = jax.block_until_ready(
        jax.jit(lambda xv: sqrtnn_forward(xv, prepped))(x_rag))
    assert y_rag.shape == (777, 1)
    assert jnp.allclose(y_rag, y_ref[:777], atol=1e-3, rtol=1e-3), "ragged mismatch"

    print("KERNEL_OK")
</pallas_src>

<mosaic_0001>
module attributes {stable_mosaic.version = 11 : i64} {
  func.func @_sqrtnn_kernel(%arg0: i32, %arg1: memref<1x1024xf32, #tpu.memory_space<vmem>>, %arg2: memref<16x16xf32, #tpu.memory_space<vmem>>, %arg3: memref<16x5xf32, #tpu.memory_space<vmem>>, %arg4: memref<1x1024xf32, #tpu.memory_space<vmem>>) attributes {dimension_semantics = [#tpu.dimension_semantics<parallel>], iteration_bounds = array<i64: 1>, scalar_prefetch = 0 : i64, scratch_operands = 0 : i64, tpu.core_type = #tpu.core_type<tc>, window_params = [{transform_indices = @transform_0, window_bounds = array<i64: 1, 1024>}, {pipeline_mode = #tpu.pipeline_mode<synchronous>, transform_indices = @transform_1, window_bounds = array<i64: 16, 16>}, {pipeline_mode = #tpu.pipeline_mode<synchronous>, transform_indices = @transform_2, window_bounds = array<i64: 16, 5>}, {transform_indices = @transform_3, window_bounds = array<i64: 1, 1024>}]} {
    %c0 = arith.constant 0 : index
    %c0_0 = arith.constant 0 : index
    %0 = vector.load %arg1[%c0, %c0_0] : memref<1x1024xf32, #tpu.memory_space<vmem>>, vector<1x1024xf32>
    %c0_1 = arith.constant 0 : index
    %c0_2 = arith.constant 0 : index
    %1 = vector.load %arg3[%c0_1, %c0_2] : memref<16x5xf32, #tpu.memory_space<vmem>>, vector<16x5xf32>
    %2 = vector.extract_strided_slice %1 {offsets = [0, 0], sizes = [16, 1], strides = [1, 1]} : vector<16x5xf32> to vector<16x1xf32>
    %3 = vector.extract_strided_slice %1 {offsets = [0, 1], sizes = [16, 1], strides = [1, 1]} : vector<16x5xf32> to vector<16x1xf32>
    %4 = vector.extract_strided_slice %1 {offsets = [0, 2], sizes = [16, 1], strides = [1, 1]} : vector<16x5xf32> to vector<16x1xf32>
    %5 = vector.extract_strided_slice %1 {offsets = [0, 3], sizes = [16, 1], strides = [1, 1]} : vector<16x5xf32> to vector<16x1xf32>
    %6 = vector.extract_strided_slice %1 {offsets = [0, 4], sizes = [1, 1], strides = [1, 1]} : vector<16x5xf32> to vector<1x1xf32>
    %7 = vector.broadcast %2 : vector<16x1xf32> to vector<16x1024xf32>
    %8 = vector.broadcast %0 : vector<1x1024xf32> to vector<16x1024xf32>
    %9 = arith.mulf %7, %8 : vector<16x1024xf32>
    %10 = vector.broadcast %3 : vector<16x1xf32> to vector<16x1024xf32>
    %11 = arith.addf %9, %10 : vector<16x1024xf32>
    %cst = arith.constant 0.000000e+00 : f32
    %12 = vector.broadcast %cst : f32 to vector<16x1024xf32>
    %13 = arith.maximumf %11, %12 : vector<16x1024xf32>
    %c0_3 = arith.constant 0 : index
    %c0_4 = arith.constant 0 : index
    %14 = vector.load %arg2[%c0_3, %c0_4] : memref<16x16xf32, #tpu.memory_space<vmem>>, vector<16x16xf32>
    %cst_5 = arith.constant dense<0.000000e+00> : vector<16x1024xf32>
    %15 = tpu.matmul %14, %13, %cst_5 {dimension_numbers = #tpu.dot_dimension_numbers<[1], [0], [0], [1], [0, 0, 1, 1], [], []>} : vector<16x16xf32>, vector<16x1024xf32>, vector<16x1024xf32> -> vector<16x1024xf32>
    %16 = vector.broadcast %4 : vector<16x1xf32> to vector<16x1024xf32>
    %17 = arith.addf %15, %16 : vector<16x1024xf32>
    %cst_6 = arith.constant 0.000000e+00 : f32
    %18 = vector.broadcast %cst_6 : f32 to vector<16x1024xf32>
    %19 = arith.maximumf %17, %18 : vector<16x1024xf32>
    %20 = vector.broadcast %5 : vector<16x1xf32> to vector<16x1024xf32>
    %21 = arith.mulf %19, %20 : vector<16x1024xf32>
    %cst_7 = arith.constant dense<0.000000e+00> : vector<1024xf32>
    %22 = vector.multi_reduction <add>, %21, %cst_7 [0] : vector<16x1024xf32> to vector<1024xf32>
    %23 = vector.shape_cast %22 : vector<1024xf32> to vector<1x1024xf32>
    %24 = vector.broadcast %6 : vector<1x1xf32> to vector<1x1024xf32>
    %25 = arith.addf %23, %24 : vector<1x1024xf32>
    %c0_8 = arith.constant 0 : index
    %c0_9 = arith.constant 0 : index
    %26 = vector.load %arg4[%c0_8, %c0_9] : memref<1x1024xf32, #tpu.memory_space<vmem>>, vector<1x1024xf32>
    tpu.vector_store %arg4[%c0_8, %c0_9], %25 {strides = array<i32>} : memref<1x1024xf32, #tpu.memory_space<vmem>>, vector<1x1024xf32>,
    return
  }
  func.func @transform_0(%arg0: i32) -> (i32, i32) {
    %c0_i32 = arith.constant 0 : i32
    %c0_i32_0 = arith.constant 0 : i32
    return %c0_i32, %arg0 : i32, i32
  }
  func.func @transform_1(%arg0: i32) -> (i32, i32) {
    %c0_i32 = arith.constant 0 : i32
    %c0_i32_0 = arith.constant 0 : i32
    %c0_i32_1 = arith.constant 0 : i32
    return %c0_i32, %c0_i32_0 : i32, i32
  }
  func.func @transform_2(%arg0: i32) -> (i32, i32) {
    %c0_i32 = arith.constant 0 : i32
    %c0_i32_0 = arith.constant 0 : i32
    %c0_i32_1 = arith.constant 0 : i32
    return %c0_i32, %c0_i32_0 : i32, i32
  }
  func.func @transform_3(%arg0: i32) -> (i32, i32) {
    %c0_i32 = arith.constant 0 : i32
    %c0_i32_0 = arith.constant 0 : i32
    return %c0_i32, %arg0 : i32, i32
  }
}

</mosaic_0001>

<bundles_post_ra>
// kernel: _lambda_.1
= control target key start
LH: loop header
LB: loop body
LE: loop exit
PB: predicated region body
PF: predicated region fallthrough
CT: control target
= control target key end

     0   :  { %8 = vsyncpa [#allocation3], 0  ;;  %s953_s0 = inlined_call_operand.hbm [shape: f32[1,1024], index: 0, kind: input, shape index: {}]   ;;  %s954_s1 = inlined_call_operand.hbm [shape: f32[16,16], index: 1, kind: input, shape index: {}]   ;;  %s955_s2 = inlined_call_operand.hbm [shape: f32[16,5], index: 2, kind: input, shape index: {}]   ;;  %s956_s3 = inlined_call_operand.hbm [shape: f32[1,1024], index: 3, kind: output, shape index: {}]  }
   0x1   :  { %9 = vsyncpa [#allocation6], 0 }
   0x2   :  { %10 = vsyncpa [#allocation4], 0  ;;  %s811_s12 = smov [#allocation5]   ;;  %s717_s16 = scalar_lea.hbm %s954_s1, 256 }
   0x3   :  { %s26_s13 = sshll.u32 %s811_s12, 4  ;;  %p718_p0 = scmp.ne.s32.totalorder %s954_s1, %s717_s16  ;;  %s27_s13 = int_to_ptr.vmem [resolvable:$true] %s26_s13 }
   0x4   :  { %p721_p1 = scmp.lt.u32.totalorder %s717_s16, %s954_s1 }
   0x6   :  { %p723_p2 = pnand %p721_p1, %p718_p0 }
   0x8   :  { %726 = shalt.err (!%p723_p2)
}
   0x9   :  { %s727_s21 = scalar_lea.vmem %s27_s13, 256  ;;  %p732_p4 = scmp.lt.s32.totalorder %s27_s13, %s27_s13 }
   0xa   :  { %p728_p3 = scmp.ne.s32.totalorder %s27_s13, %s727_s21  ;;  %p733_p5 = scmp.lt.s32.totalorder %s727_s21, %s727_s21 }
   0xc   :  { %p734_p6 = por %p733_p5, %p732_p4 }
   0xe   :  { %p735_p7 = pnand %p734_p6, %p728_p3 }
  0x10   :  { %738 = shalt.err (!%p735_p7)
}
  0x11   :  { %s812_s22 = smov 128   ;;  %s813_s23 = smov 8  }
  0x12   :  { %32 = dma.hbm_to_vmem [thread:$0]  %s954_s1, 256, %s27_s13, [#allocation6], %s812_s22, %s812_s22, %s813_s23  }
  0x13   :  { %s814_s26 = smov [#allocation2]   ;;  %s815_s28 = smov [#allocation7]  }
  0x14   :  { %s17_s27 = sshll.u32 %s814_s26, 4  ;;  %s38_s29 = sshll.u32 %s815_s28, 4  ;;  %s18_s27 = int_to_ptr.vmem [resolvable:$true] %s17_s27  ;;  %s39_s29 = int_to_ptr.vmem [resolvable:$true] %s38_s29 }
  0x15   :  { %s739_s5 = scalar_lea.hbm %s953_s0, 128 }
  0x16   :  { %p740_p8 = scmp.ne.s32.totalorder %s953_s0, %s739_s5  ;;  %p743_p9 = scmp.lt.u32.totalorder %s739_s5, %s953_s0 }
  0x18   :  { %p745_p10 = pnand %p743_p9, %p740_p8 }
  0x1a   :  { %748 = shalt.err (!%p745_p10)
}
  0x1b   :  { %s749_s1 = scalar_lea.vmem %s18_s27, 128  ;;  %p754_p12 = scmp.lt.s32.totalorder %s18_s27, %s18_s27 }
  0x1c   :  { %p750_p11 = scmp.ne.s32.totalorder %s18_s27, %s749_s1  ;;  %p755_p13 = scmp.lt.s32.totalorder %s749_s1, %s749_s1 }
  0x1e   :  { %p756_p0 = por %p755_p13, %p754_p12 }
  0x20   :  { %p757_p1 = pnand %p756_p0, %p750_p11 }
  0x22   :  { %760 = shalt.err (!%p757_p1)
}
  0x23   :  { %20 = dma.hbm_to_vmem [thread:$0]  %s953_s0, 128, %s18_s27, [#allocation3]  }
  0x24   :  { %s761_s14 = scalar_lea.hbm %s955_s2, 256 }
  0x25   :  { %p762_p2 = scmp.ne.s32.totalorder %s955_s2, %s761_s14  ;;  %p765_p3 = scmp.lt.u32.totalorder %s761_s14, %s955_s2 }
  0x27   :  { %p767_p4 = pnand %p765_p3, %p762_p2 }
  0x29   :  { %770 = shalt.err (!%p767_p4)
}
  0x2a   :  { %s771_s19 = scalar_lea.vmem %s39_s29, 256  ;;  %p776_p6 = scmp.lt.s32.totalorder %s39_s29, %s39_s29 }
  0x2b   :  { %p772_p5 = scmp.ne.s32.totalorder %s39_s29, %s771_s19  ;;  %p777_p7 = scmp.lt.s32.totalorder %s771_s19, %s771_s19 }
  0x2d   :  { %p778_p8 = por %p777_p7, %p776_p6 }
  0x2f   :  { %p779_p9 = pnand %p778_p8, %p772_p5 }
  0x31   :  { %782 = shalt.err (!%p779_p9)
}
  0x32   :  { %44 = dma.hbm_to_vmem [thread:$0]  %s955_s2, 256, %s39_s29, [#allocation6], %s812_s22, %s812_s22, %s813_s23  }
  0x33   :  { %805 = dma.done.wait [#allocation3], 128  }
  0x34   :  { %806 = vsyncadd [#allocation3], 4294967168 }
  0x35   :  { %807 = dma.done.wait [#allocation6], 512  }
  0x36   :  { %808 = vsyncadd [#allocation6], 4294966784  ;;  %v816_v0 = vmov 1   ;;  %v817_v1 = vmov 0   ;;  %v55_v2 = vld [vmem:[#allocation7] sm:$0xff]  ;;  %v56_v3 = vld [vmem:[#allocation7 + $0x8] sm:$0xff]  ;;  %v68_v8 = vlaneseq }
  0x37   :  { %710 = vset.pattern.permute.xlu1 %v816_v0  ;;  %709 = vset.pattern.permute.xlu0 %v817_v1  ;;  %v818_v4 = vmov 0.0   ;;  %v819_v5 = vmov 2   ;;  %v820_v6 = vmov 3   ;;  %v821_v7 = vmov 4   ;;  %v54_v14 = vld [vmem:[#allocation2] sm:$0xff]  ;;  %s823_s2 = smov [#allocation8]  }
  0x38   :  { %125 = vperm.xlu1 %710, %v55_v2   ;;  %59 = vperm.xlu0 %709, %v55_v2   ;;  %v888_v9 = vshrl.u32 %v68_v8, 7  ;;  %vm174_vm0 = vcmask 130048   ;;  %s662_s21 = sshll.u32 %s823_s2, 4  ;;  %s663_s21 = int_to_ptr.vmem [resolvable:$true] %s662_s21 }
  0x39   :  { %245 = vmatprep.mubr.f32.mxu0 %v818_v4  ;;  %322 = vmatprep.mubr.f32.mxu1 %v818_v4  ;;  %s783_s22 = scalar_lea.vmem %s663_s21, 128  ;;  %p788_p11 = scmp.lt.s32.totalorder %s663_s21, %s663_s21 }
  0x3a   :  { %v74_v10 = vsub.s32 1, %v888_v9  ;;  %v82_v11 = vsub.s32 3, %v888_v9  ;;  %v70_v12 = vsub.s32 0, %v888_v9  ;;  %v78_v13 = vsub.s32 2, %v888_v9  ;;  %p784_p10 = scmp.ne.s32.totalorder %s663_s21, %s783_s22  ;;  %p789_p12 = scmp.lt.s32.totalorder %s783_s22, %s783_s22 }
  0x3b   :  { %v90_v15 = vsub.s32 5, %v888_v9  ;;  %v98_v16 = vsub.s32 7, %v888_v9  ;;  %v86_v17 = vsub.s32 4, %v888_v9  ;;  %v94_v18 = vsub.s32 6, %v888_v9 }
  0x3c   :  { %129 = vperm.xlu1 %710, %v56_v3   ;;  %64 = vperm.xlu0 %709, %v56_v3   ;;  %v75_v19 = vrot.slane %v54_v14, %v74_v10  ;;  %v83_v20 = vrot.slane %v54_v14, %v82_v11  ;;  %v71_v21 = vrot.slane %v54_v14, %v70_v12  ;;  %p790_p13 = por %p789_p12, %p788_p11 }
  0x3d   :  { %v79_v22 = vrot.slane %v54_v14, %v78_v13  ;;  %v91_v23 = vrot.slane %v54_v14, %v90_v15  ;;  %v99_v24 = vrot.slane %v54_v14, %v98_v16  ;;  %v87_v25 = vrot.slane %v54_v14, %v86_v17 }
  0x3e   :  { %v95_v26 = vrot.slane %v54_v14, %v94_v18  ;;  %p791_p0 = pnand %p790_p13, %p784_p10 }
  0x40   :  { %712 = vset.pattern.permute.xlu1 %v819_v5  ;;  %711 = vset.pattern.permute.xlu0 %v819_v5 }
  0x41   :  { %171 = vperm.xlu1 %712, %v56_v3   ;;  %167 = vperm.xlu0 %711, %v55_v2  }
  0x45   :  { %713 = vset.pattern.permute.xlu1 %v820_v6  ;;  %714 = vset.pattern.permute.xlu0 %v820_v6 }
  0x46   :  { %506 = vperm.xlu1 %713, %v55_v2   ;;  %510 = vperm.xlu0 %714, %v56_v3  }
  0x4a   :  { %715 = vset.pattern.permute.xlu1 %v821_v7  ;;  %716 = vset.pattern.permute.xlu0 %v821_v7 }
  0x4b   :  { %586 = vperm.xlu1 %715, %v55_v2  }
  0xb7   :  { %v126_v27 = vpop.permute.xlu1 %125  ;;  %v60_v28 = vpop.permute.xlu0 %59 }
  0xb8   :  { %v109_v29 = vmul.f32 %v75_v19, %v60_v28  ;;  %v111_v30 = vmul.f32 %v83_v20, %v60_v28  ;;  %v108_v31 = vmul.f32 %v71_v21, %v60_v28  ;;  %v110_v32 = vmul.f32 %v79_v22, %v60_v28 }
  0xb9   :  { %v113_v33 = vmul.f32 %v91_v23, %v60_v28  ;;  %v115_v34 = vmul.f32 %v99_v24, %v60_v28  ;;  %v112_v35 = vmul.f32 %v87_v25, %v60_v28  ;;  %v114_v36 = vmul.f32 %v95_v26, %v60_v28 }
  0xba   :  { %v133_v37 = vadd.f32 %v126_v27, %v109_v29  ;;  %v135_v38 = vadd.f32 %v126_v27, %v111_v30  ;;  %v132_v39 = vadd.f32 %v126_v27, %v108_v31  ;;  %v134_v40 = vadd.f32 %v126_v27, %v110_v32 }
  0xbb   :  { %v65_v41 = vpop.permute.xlu0 %64  ;;  %v137_v42 = vadd.f32 %v126_v27, %v113_v33  ;;  %v139_v43 = vadd.f32 %v126_v27, %v115_v34  ;;  %v136_v44 = vadd.f32 %v126_v27, %v112_v35  ;;  %v138_v48 = vadd.f32 %v126_v27, %v114_v36  ;;  %v130_v49 = vpop.permute.xlu1 %129 }
  0xbc   :  { %v117_v45 = vmul.f32 %v75_v19, %v65_v41  ;;  %v149_v46 = vmax.f32 %v133_v37, 0.0  ;;  %v119_v47 = vmul.f32 %v83_v20, %v65_v41  ;;  %v151_v50 = vmax.f32 %v135_v38, 0.0  ;;  %v164_v19 = vld [vmem:[#allocation5] sm:$0xff] }
  0xbd   :  { %v116_v51 = vmul.f32 %v71_v21, %v65_v41  ;;  %v148_v52 = vmax.f32 %v132_v39, 0.0  ;;  %v118_v53 = vmul.f32 %v79_v22, %v65_v41  ;;  %v150_v56 = vmax.f32 %v134_v40, 0.0 }
  0xbe   :  { %v141_v54 = vadd.f32 %v130_v49, %v117_v45  ;;  %v143_v55 = vadd.f32 %v130_v49, %v119_v47  ;;  %v121_v57 = vmul.f32 %v91_v23, %v65_v41  ;;  %v153_v60 = vmax.f32 %v137_v42, 0.0 }
  0xbf   :  { %v140_v58 = vadd.f32 %v130_v49, %v116_v51  ;;  %v142_v59 = vadd.f32 %v130_v49, %v118_v53  ;;  %v123_v61 = vmul.f32 %v99_v24, %v65_v41  ;;  %v120_v1 = vmul.f32 %v87_v25, %v65_v41 }
  0xc0   :  { %v157_v62 = vmax.f32 %v141_v54, 0.0  ;;  %v159_v63 = vmax.f32 %v143_v55, 0.0  ;;  %v145_v0 = vadd.f32 %v130_v49, %v121_v57  ;;  %v155_v6 = vmax.f32 %v139_v43, 0.0  ;;  %v912_v27 = vpop.permute.xlu1 %171  ;;  %v168_v28 = vpop.permute.xlu0 %167 }
  0xc1   :  { %v156_v2 = vmax.f32 %v140_v58, 0.0  ;;  %v158_v3 = vmax.f32 %v142_v59, 0.0  ;;  %v147_v5 = vadd.f32 %v130_v49, %v123_v61  ;;  %v144_v11 = vadd.f32 %v130_v49, %v120_v1 }
  0xc2   :  { %v680_v7 = vpack.c.bf16 %v157_v62, %v149_v46  ;;  %v684_v8 = vpack.c.bf16 %v159_v63, %v151_v50  ;;  %v161_v10 = vmax.f32 %v145_v0, 0.0  ;;  %v122_v15 = vmul.f32 %v95_v26, %v65_v41  ;;  %v165_v26 = vld [vmem:[#allocation5 + $0x8] sm:$0xff] }
  0xc3   :  { %v682_v12 = vpack.c.bf16 %v156_v2, %v148_v52  ;;  %v686_v13 = vpack.c.bf16 %v158_v3, %v150_v56  ;;  %v163_v14 = vmax.f32 %v147_v5, 0.0  ;;  %v160_v17 = vmax.f32 %v144_v11, 0.0 }
  0xc4   :  { %681 = vmatprep.subr.bf16.mxu0 %v680_v7  ;;  %685 = vmatprep.subr.bf16.mxu1 %v684_v8  ;;  %v688_v16 = vpack.c.bf16 %v161_v10, %v153_v60  ;;  %v152_v20 = vmax.f32 %v136_v44, 0.0  ;;  %v146_v21 = vadd.f32 %v130_v49, %v122_v15  ;;  %v154_v23 = vmax.f32 %v138_v48, 0.0 }
  0xc5   :  { %683 = vmatpush1.bf16.msra.mxu0 %v682_v12  ;;  %687 = vmatpush1.bf16.msra.mxu1 %v686_v13  ;;  %v692_v18 = vpack.c.bf16 %v163_v14, %v155_v6  ;;  %v822_v29 = vmov 1966171168   ;;  %v507_v41 = vpop.permute.xlu1 %506  ;;  %v918_v52 = vpop.permute.xlu0 %510 }
  0xc6   :  { %689 = vmatprep.subr.bf16.mxu0 %v688_v16  ;;  %v690_v22 = vpack.c.bf16 %v160_v17, %v152_v20  ;;  %v162_v24 = vmax.f32 %v146_v21, 0.0  ;;  %v610_v30 = vunpack.c.l.s4 %v822_v29 }
  0xc7   :  { %693 = vmatprep.subr.bf16.mxu1 %v692_v18 }
  0xc8   :  { %672 = vmatmul.mubr.msk.f32.vlgmr.msra.gmra.mrb[0].mxu0 %vm174_vm0, %v164_v19  ;;  %674 = vmatmul.mubr.msk.f32.vlgmr.msra.gmra.mrb[0].mxu1 %vm174_vm0, %v164_v19  ;;  %v694_v25 = vpack.c.bf16 %v162_v24, %v154_v23  ;;  %v611_v39 = vunpack.c.0.s8 %v610_v30 }
  0xc9   :  { %691 = vmatpush1.bf16.msra.mxu0 %v690_v22  ;;  %251 = vmatprep.mubr.f32.mxu0 %v818_v4 }
  0xca   :  { %328 = vmatprep.mubr.f32.mxu1 %v818_v4  ;;  %695 = vmatpush1.bf16.msra.mxu1 %v694_v25  ;;  %v921_v53 = vsub.s32 %v611_v39, %v888_v9 }
  0xcc   :  { %673 = vmatmul.mubr.msk.f32.gmra.mrb[2].mxu0 %vm174_vm0, %v165_v26  ;;  %675 = vmatmul.mubr.msk.f32.gmra.mrb[2].mxu1 %vm174_vm0, %v165_v26 }
  0xcd   :  { %399 = vmatprep.mubr.f32.mxu0 %v818_v4  ;;  %476 = vmatprep.mubr.f32.mxu1 %v818_v4 }
  0xd0   :  { %676 = vmatmul.mubr.msk.f32.vlgmr.msra.gmra.mrb[4].mxu0 %vm174_vm0, %v164_v19  ;;  %678 = vmatmul.mubr.msk.f32.vlgmr.msra.gmra.mrb[4].mxu1 %vm174_vm0, %v164_v19 }
  0xd1   :  { %405 = vmatprep.mubr.f32.mxu0 %v818_v4  ;;  %482 = vmatprep.mubr.f32.mxu1 %v818_v4 }
  0xd4   :  { %677 = vmatmul.mubr.msk.f32.gmra.mrb[6].mxu0 %vm174_vm0, %v165_v26  ;;  %679 = vmatmul.mubr.msk.f32.gmra.mrb[6].mxu1 %vm174_vm0, %v165_v26 }
 0x19b   :  { %v247_v31 = vpop.f32.mrb[0].mxu0  ;;  %v324_v32 = vpop.f32.mrb[0].mxu1 }
 0x19c   :  { %v248_v33 = vadd.f32 %v247_v31, %v168_v28  ;;  %v325_v34 = vadd.f32 %v324_v32, %v168_v28  ;;  %v249_v35 = vpop.f32.mrb[1].mxu0  ;;  %v326_v36 = vpop.f32.mrb[1].mxu1 }
 0x19d   :  { %v250_v37 = vadd.f32 %v249_v35, %v168_v28  ;;  %v327_v38 = vadd.f32 %v326_v36, %v168_v28 }
 0x19e   :  { %v489_v40 = vmax.f32 %v248_v33, 0.0  ;;  %v491_v4 = vmax.f32 %v325_v34, 0.0 }
 0x19f   :  { %v490_v42 = vmax.f32 %v250_v37, 0.0  ;;  %v492_v43 = vmax.f32 %v327_v38, 0.0  ;;  %v253_v44 = vpop.f32.mrb[2].mxu0  ;;  %v330_v45 = vpop.f32.mrb[2].mxu1 }
 0x1a0   :  { %v254_v46 = vadd.f32 %v253_v44, %v912_v27  ;;  %v331_v47 = vadd.f32 %v330_v45, %v912_v27  ;;  %v255_v48 = vpop.f32.mrb[3].mxu0  ;;  %v332_v49 = vpop.f32.mrb[3].mxu1  ;;  %v513_v56 = vmul.f32 %v507_v41, %v489_v40  ;;  %v515_v57 = vmul.f32 %v507_v41, %v491_v4 }
 0x1a1   :  { %v256_v50 = vadd.f32 %v255_v48, %v912_v27  ;;  %v333_v51 = vadd.f32 %v332_v49, %v912_v27  ;;  %v514_v60 = vmul.f32 %v507_v41, %v490_v42  ;;  %v516_v61 = vmul.f32 %v507_v41, %v492_v43 }
 0x1a2   :  { %v497_v54 = vmax.f32 %v254_v46, 0.0  ;;  %v499_v55 = vmax.f32 %v331_v47, 0.0 }
 0x1a3   :  { %v498_v58 = vmax.f32 %v256_v50, 0.0  ;;  %v500_v59 = vmax.f32 %v333_v51, 0.0  ;;  %v401_v62 = vpop.f32.mrb[4].mxu0  ;;  %v478_v63 = vpop.f32.mrb[4].mxu1 }
 0x1a4   :  { %v521_v0 = vmul.f32 %v918_v52, %v497_v54  ;;  %v523_v1 = vmul.f32 %v918_v52, %v499_v55  ;;  %v402_v2 = vadd.f32 %v401_v62, %v168_v28  ;;  %v479_v3 = vadd.f32 %v478_v63, %v168_v28  ;;  %v403_v5 = vpop.f32.mrb[5].mxu0  ;;  %v480_v6 = vpop.f32.mrb[5].mxu1 }
 0x1a5   :  { %v522_v9 = vmul.f32 %v918_v52, %v498_v58  ;;  %v524_v7 = vmul.f32 %v918_v52, %v500_v59  ;;  %v404_v8 = vadd.f32 %v403_v5, %v168_v28  ;;  %v481_v10 = vadd.f32 %v480_v6, %v168_v28  ;;  %v587_v62 = vpop.permute.xlu1 %586 }
 0x1a6   :  { %v529_v11 = vadd.f32 %v521_v0, %v513_v56  ;;  %v543_v12 = vadd.f32 %v523_v1, %v515_v57  ;;  %v493_v13 = vmax.f32 %v402_v2, 0.0  ;;  %v495_v14 = vmax.f32 %v479_v3, 0.0 }
 0x1a7   :  { %v536_v15 = vadd.f32 %v522_v9, %v514_v60  ;;  %v550_v16 = vadd.f32 %v524_v7, %v516_v61  ;;  %v494_v17 = vmax.f32 %v404_v8, 0.0  ;;  %v496_v18 = vmax.f32 %v481_v10, 0.0  ;;  %v407_v19 = vpop.f32.mrb[6].mxu0  ;;  %v484_v20 = vpop.f32.mrb[6].mxu1 }
 0x1a8   :  { %v530_v21 = vrot.slane %v529_v11, 4  ;;  %v544_v22 = vrot.slane %v543_v12, 4  ;;  %v517_v23 = vmul.f32 %v507_v41, %v493_v13  ;;  %v519_v24 = vmul.f32 %v507_v41, %v495_v14  ;;  %v409_v25 = vpop.f32.mrb[7].mxu0  ;;  %v486_v26 = vpop.f32.mrb[7].mxu1 }
 0x1a9   :  { %v537_v29 = vrot.slane %v536_v15, 4  ;;  %v551_v30 = vrot.slane %v550_v16, 4  ;;  %v518_v31 = vmul.f32 %v507_v41, %v494_v17  ;;  %v520_v28 = vmul.f32 %v507_v41, %v496_v18 }
 0x1aa   :  { %v531_v32 = vadd.f32 %v530_v21, %v529_v11  ;;  %v545_v33 = vadd.f32 %v544_v22, %v543_v12  ;;  %v408_v34 = vadd.f32 %v407_v19, %v912_v27  ;;  %v485_v35 = vadd.f32 %v484_v20, %v912_v27 }
 0x1ab   :  { %v538_v36 = vadd.f32 %v537_v29, %v536_v15  ;;  %v552_v37 = vadd.f32 %v551_v30, %v550_v16  ;;  %v410_v38 = vadd.f32 %v409_v25, %v912_v27  ;;  %v487_v39 = vadd.f32 %v486_v26, %v912_v27 }
 0x1ac   :  { %v501_v40 = vmax.f32 %v408_v34, 0.0  ;;  %v503_v4 = vmax.f32 %v485_v35, 0.0  ;;  %v532_v42 = vrot.slane %v531_v32, 2  ;;  %v546_v43 = vrot.slane %v545_v33, 2 }
 0x1ad   :  { %v502_v44 = vmax.f32 %v410_v38, 0.0  ;;  %v504_v45 = vmax.f32 %v487_v39, 0.0  ;;  %v539_v46 = vrot.slane %v538_v36, 2  ;;  %v553_v41 = vrot.slane %v552_v37, 2 }
 0x1ae   :  { %v525_v47 = vmul.f32 %v918_v52, %v501_v40  ;;  %v527_v48 = vmul.f32 %v918_v52, %v503_v4  ;;  %v533_v49 = vadd.f32 %v532_v42, %v531_v32  ;;  %v547_v50 = vadd.f32 %v546_v43, %v545_v33 }
 0x1af   :  { %v526_v51 = vmul.f32 %v918_v52, %v502_v44  ;;  %v528_v54 = vmul.f32 %v918_v52, %v504_v45  ;;  %v540_v55 = vadd.f32 %v539_v46, %v538_v36  ;;  %v554_v27 = vadd.f32 %v553_v41, %v552_v37 }
 0x1b0   :  { %v557_v56 = vadd.f32 %v525_v47, %v517_v23  ;;  %v571_v57 = vadd.f32 %v527_v48, %v519_v24  ;;  %v534_v58 = vrot.slane %v533_v49, 1  ;;  %v548_v59 = vrot.slane %v547_v50, 1 }
 0x1b1   :  { %v564_v60 = vadd.f32 %v526_v51, %v518_v31  ;;  %v578_v61 = vadd.f32 %v528_v54, %v520_v28  ;;  %v541_v63 = vrot.slane %v540_v55, 1  ;;  %v555_v0 = vrot.slane %v554_v27, 1 }
 0x1b2   :  { %v558_v1 = vrot.slane %v557_v56, 4  ;;  %v572_v2 = vrot.slane %v571_v57, 4  ;;  %v535_v3 = vadd.f32 %v534_v58, %v533_v49  ;;  %v549_v5 = vadd.f32 %v548_v59, %v547_v50 }
 0x1b3   :  { %v565_v6 = vrot.slane %v564_v60, 4  ;;  %v579_v9 = vrot.slane %v578_v61, 4  ;;  %v542_v7 = vadd.f32 %v541_v63, %v540_v55  ;;  %v556_v8 = vadd.f32 %v555_v0, %v554_v27 }
 0x1b4   :  { %v559_v52 = vadd.f32 %v558_v1, %v557_v56  ;;  %v573_v10 = vadd.f32 %v572_v2, %v571_v57  ;;  %v589_v11 = vadd.f32 %v587_v62, %v535_v3  ;;  %v591_v12 = vadd.f32 %v587_v62, %v549_v5 }
 0x1b5   :  { %v566_v13 = vadd.f32 %v565_v6, %v564_v60  ;;  %v580_v14 = vadd.f32 %v579_v9, %v578_v61  ;;  %v590_v15 = vadd.f32 %v587_v62, %v542_v7  ;;  %v592_v16 = vadd.f32 %v587_v62, %v556_v8 }
 0x1b6   :  { %v560_v17 = vrot.slane %v559_v52, 2  ;;  %v574_v18 = vrot.slane %v573_v10, 2 }
 0x1b7   :  { %v567_v19 = vrot.slane %v566_v13, 2  ;;  %v581_v20 = vrot.slane %v580_v14, 2  ;;  %v605_v21 = vcombine.low %v589_v11, %v590_v15  ;;  %v606_v22 = vcombine.low %v591_v12, %v592_v16 }
 0x1b8   :  { %v561_v23 = vadd.f32 %v560_v17, %v559_v52  ;;  %v575_v24 = vadd.f32 %v574_v18, %v573_v10 }
 0x1b9   :  { %v568_v25 = vadd.f32 %v567_v19, %v566_v13  ;;  %v582_v26 = vadd.f32 %v581_v20, %v580_v14  ;;  %v615_v29 = vrot.slane %v605_v21, %v921_v53  ;;  %v622_v30 = vrot.slane %v606_v22, %v921_v53 }
 0x1ba   :  { %v562_v31 = vrot.slane %v561_v23, 1  ;;  %v576_v28 = vrot.slane %v575_v24, 1 }
 0x1bb   :  { %v569_v32 = vrot.slane %v568_v25, 1  ;;  %v583_v33 = vrot.slane %v582_v26, 1  ;;  %v637_v34 = vcombine.low %v615_v29, %v622_v30 }
 0x1bc   :  { %v563_v35 = vadd.f32 %v562_v31, %v561_v23  ;;  %v577_v36 = vadd.f32 %v576_v28, %v575_v24 }
 0x1bd   :  { %v570_v37 = vadd.f32 %v569_v32, %v568_v25  ;;  %v584_v38 = vadd.f32 %v583_v33, %v582_v26  ;;  %v645_v47 = vrot.slane %v637_v34, %v921_v53 }
 0x1be   :  { %v593_v39 = vadd.f32 %v587_v62, %v563_v35  ;;  %v595_v40 = vadd.f32 %v587_v62, %v577_v36 }
 0x1bf   :  { %v594_v4 = vadd.f32 %v587_v62, %v570_v37  ;;  %v596_v42 = vadd.f32 %v587_v62, %v584_v38 }
 0x1c1   :  { %v607_v43 = vcombine.low %v593_v39, %v594_v4  ;;  %v608_v44 = vcombine.low %v595_v40, %v596_v42 }
 0x1c3   :  { %v629_v45 = vrot.slane %v607_v43, %v921_v53  ;;  %v636_v46 = vrot.slane %v608_v44, %v921_v53 }
 0x1c5   :  { %v638_v41 = vcombine.low %v629_v45, %v636_v46 }
 0x1c7   :  { %v652_v48 = vrot.slane %v638_v41, %v921_v53 }
 0x1c9   :  { %v653_v49 = vcombine.low %v645_v47, %v652_v48 }
 0x1cb   :  { %655 = vst [vmem:[#allocation8] sm:$0xff] %v653_v49 }
 0x1cc   :  { %794 = shalt.err (!%p791_p0)
}
 0x1cd   :  { %s795_s25 = scalar_lea.hbm %s956_s3, 128 }
 0x1ce   :  { %p796_p1 = scmp.ne.s32.totalorder %s956_s3, %s795_s25  ;;  %p799_p2 = scmp.lt.u32.totalorder %s795_s25, %s956_s3 }
 0x1d0   :  { %p801_p3 = pnand %p799_p2, %p796_p1 }
 0x1d2   :  { %804 = shalt.err (!%p801_p3)
}
 0x1d3   :  { %665 = dma.vmem_to_hbm [thread:$0]  %s663_s21, 128, %s956_s3, [#allocation4]  }
 0x1d4   :  { %809 = dma.done.wait [#allocation4], 128  }
 0x1d5   :  { %810 = vsyncadd [#allocation4], 4294967168 }
 0x1d6   :  { %669 = vsyncpa [#allocation3], 1 }
 0x1d7   :  { %670 = vsyncpa [#allocation6], 1 }
 0x1d8   :  { %671 = vsyncpa [#allocation4], 1 }

</bundles_post_ra>
